<compile_context>
chip_gen: v5e
topology: v5e:2x2
jax: 0.10.0
libtpu: 0.0.40
codegen_flags: <defaults>
</compile_context>

<pallas_src>
import math

import jax
import jax.numpy as jnp
from jax.experimental import pallas as pl
from jax.experimental.pallas import tpu as pltpu

# ---------------- config (small, consistent with the module) ----------------
B = 2                  # batch
IMG_C, IMG_H, IMG_W = 3, 16, 16
NUM_CHANNELS = 8       # backbone.num_channels  (level0 uses NUM_CHANNELS // 2)
HIDDEN = 32            # transformer.d_model
NUM_QUERIES = 8
NUM_ROLL = 2
NUM_LAYERS = 2         # decoder layers of the transformer stand-in

C0 = NUM_CHANNELS // 2                 # level-0 channels (4)
C1 = NUM_CHANNELS                      # level-1 channels (8)
S0 = (IMG_H // 2) * (IMG_W // 2)       # 64 tokens from level 0
S1 = (IMG_H // 4) * (IMG_W // 4)       # 16 tokens from level 1
S_TOTAL = S0 + S1                      # 80
NQ_TOTAL = NUM_ROLL * NUM_QUERIES      # 16

# ---- packed parameter slab layout (row offsets, each section 8-row aligned) ----
W_OFF = 0                                # fused [W0;W1] proj weights: 2*IMG_C rows used
HASH_OFF = 8                             # hash head weight: 1 row used
QE_OFF = 16                              # base query embedding: NUM_QUERIES rows
WO_OFF = QE_OFF + NUM_QUERIES            # 24: decoder output proj, NUM_LAYERS*HIDDEN rows
P_ROWS = WO_OFF + NUM_LAYERS * HIDDEN    # 88

# ---- packed output slab column layout ----
HS_ORI_COL = 0
HS_COL = HIDDEN
ATTN_COL = 2 * HIDDEN
PRED_COL = 2 * HIDDEN + S_TOTAL
OUT_COLS = PRED_COL + 1                  # 145


# ============================ fused Pallas kernel ============================

def _fused_forward_kernel(px_ref, pos_ref, w_ref, out_ref):
    """One grid step = one batch element.  All refs are 2-D (batch squeezed)."""
    # ---- fused 1x1-conv projections (backbone mix folded into W) + pos add ----
    w_proj = w_ref[W_OFF:W_OFF + 2 * IMG_C, :]                       # (6, D)
    mem = (jnp.dot(px_ref[...], w_proj,
                   preferred_element_type=jnp.float32)
           + pos_ref[...])                                           # (S, D); conv biases folded into pos

    # ---- shifted query embeddings (torch.roll + cat), built in-kernel ----
    qe_base = w_ref[QE_OFF:QE_OFF + NUM_QUERIES, :]                  # (Nq, D)
    parts = []
    for i in range(NUM_ROLL):                                        # static loop
        sh = (i * HIDDEN // NUM_ROLL) % HIDDEN
        if sh == 0:
            parts.append(qe_base)
        else:
            parts.append(jnp.concatenate(
                [qe_base[:, HIDDEN - sh:], qe_base[:, :HIDDEN - sh]], axis=-1))
    qe = jnp.concatenate(parts, axis=0)                              # (NQ_TOTAL, D)

    # ---- transformer stand-in: NUM_LAYERS single-head cross-attention layers ----
    scale = 1.0 / math.sqrt(HIDDEN)
    tgt = jnp.zeros((NQ_TOTAL, HIDDEN), jnp.float32)
    attn = jnp.zeros((NQ_TOTAL, S_TOTAL), jnp.float32)
    for l in range(NUM_LAYERS):                                      # static loop
        q = (tgt + qe) * scale                                       # scale folded into q
        s = jax.lax.dot_general(q, mem, (((1,), (1,)), ((), ())),
                                preferred_element_type=jnp.float32)  # (Nq, S), no mem.T materialized
        s = s - jnp.max(s, axis=-1, keepdims=True)
        p = jnp.exp(s)
        # exact reciprocal keeps bit-accuracy of the softmax (row sums == 1)
        attn = p * pl.reciprocal(jnp.sum(p, axis=-1, keepdims=True), approx=False)
        ctx = jnp.dot(attn, mem, preferred_element_type=jnp.float32)             # (Nq, D)
        wo_l = w_ref[WO_OFF + l * HIDDEN:WO_OFF + (l + 1) * HIDDEN, :]            # (D, D)
        tgt = tgt + jnp.dot(ctx, wo_l, preferred_element_type=jnp.float32)

    # ---- hash head (last layer only): F.normalize(p=2) + Linear(D,1) + tanh ----
    inv = jax.lax.rsqrt(jnp.sum(tgt * tgt, axis=-1, keepdims=True) + 1e-24)       # EUP rsqrt
    hsn = tgt * inv
    hash_w = w_ref[HASH_OFF:HASH_OFF + 1, :]                                      # (1, D)
    pred = jnp.tanh(jnp.sum(hsn * hash_w, axis=-1, keepdims=True))                # (Nq, 1)

    # ---- single lane-packed output slab: [hs_ori | hs | attn | pred] ----
    out_ref[...] = jnp.concatenate([tgt, hsn, attn, pred], axis=-1)               # (Nq, 145)


def fused_forward(px, pos_eff, param_slab):
    """One pallas_call for the whole forward (after the external backbone)."""
    return pl.pallas_call(
        _fused_forward_kernel,
        grid=(B,),
        out_shape=jax.ShapeDtypeStruct((B, NQ_TOTAL, OUT_COLS), jnp.float32),
        in_specs=[
            pl.BlockSpec((None, S_TOTAL, 2 * IMG_C), lambda b: (b, 0, 0)),  # pooled pixels
            pl.BlockSpec((None, S_TOTAL, HIDDEN), lambda b: (b, 0, 0)),     # pos (+biases)
            pl.BlockSpec((P_ROWS, HIDDEN), lambda b: (0, 0)),               # packed params (fetched once)
        ],
        out_specs=pl.BlockSpec((None, NQ_TOTAL, OUT_COLS), lambda b: (b, 0, 0)),
        compiler_params=pltpu.CompilerParams(
            dimension_semantics=("parallel",)),   # batch split across TCs on v7x
    )(px, pos_eff, param_slab)


# ============================ plain-JAX glue ============================

def init_params(key):
    ks = jax.random.split(key, 10)
    s = 0.1
    return {
        # backbone stand-in (channel mixers) + flattened positional encoding
        "bb_w0": s * jax.random.normal(ks[0], (IMG_C, C0), jnp.float32),
        "bb_w1": s * jax.random.normal(ks[1], (IMG_C, C1), jnp.float32),
        "pos": s * jax.random.normal(ks[2], (B, S_TOTAL, HIDDEN), jnp.float32),
        # input_proj_list (1x1 convs)
        "proj_w0": s * jax.random.normal(ks[3], (C0, HIDDEN), jnp.float32),
        "proj_b0": s * jax.random.normal(ks[4], (HIDDEN,), jnp.float32),
        "proj_w1": s * jax.random.normal(ks[5], (C1, HIDDEN), jnp.float32),
        "proj_b1": s * jax.random.normal(ks[6], (HIDDEN,), jnp.float32),
        # query embedding, transformer stand-in weights, hash head
        "query_embed": s * jax.random.normal(ks[7], (NUM_QUERIES, HIDDEN), jnp.float32),
        "wo": s * jax.random.normal(ks[8], (NUM_LAYERS, HIDDEN, HIDDEN), jnp.float32),
        "hash_w": s * jax.random.normal(ks[9], (1, HIDDEN), jnp.float32),
    }


@jax.jit
def my_model_forward(samples, params):
    # TODO(synk): the real backbone is an external ResNet-style module; this
    # stand-in is avg-pooling only — its channel mix is folded into the
    # kernel's fused projection weights below (mathematically identical).
    def pool_tokens(x, k):
        Bb, C, H, W = x.shape
        p = x.reshape(Bb, C, H // k, k, W // k, k).mean(axis=(3, 5))   # (B,C,H/k,W/k)
        return p.transpose(0, 2, 3, 1).reshape(Bb, (H // k) * (W // k), C)

    p0 = pool_tokens(samples, 2)                        # (B, S0, IMG_C)
    p1 = pool_tokens(samples, 4)                        # (B, S1, IMG_C)
    # block-diagonal packing so one matmul handles both levels in the kernel
    px = jnp.concatenate(
        [jnp.concatenate([p0, jnp.zeros_like(p0)], axis=-1),
         jnp.concatenate([jnp.zeros_like(p1), p1], axis=-1)], axis=1)  # (B, S, 2*IMG_C)

    # positional encoding with the per-level conv biases folded in
    bias_map = jnp.concatenate(
        [jnp.broadcast_to(params["proj_b0"][None, :], (S0, HIDDEN)),
         jnp.broadcast_to(params["proj_b1"][None, :], (S1, HIDDEN))], axis=0)
    pos_eff = params["pos"] + bias_map[None]            # (B, S, D)

    # fused projection weights (backbone channel mix folded in) + packed slab
    w_fused = jnp.concatenate([params["bb_w0"] @ params["proj_w0"],
                               params["bb_w1"] @ params["proj_w1"]], axis=0)  # (2*IMG_C, D)

    def pad_rows(x, rows):
        return jnp.concatenate(
            [x, jnp.zeros((rows - x.shape[0], HIDDEN), x.dtype)], axis=0)

    param_slab = jnp.concatenate([
        pad_rows(w_fused, HASH_OFF - W_OFF),            # rows  0..7  (6 used)
        pad_rows(params["hash_w"], QE_OFF - HASH_OFF),  # rows  8..15 (1 used)
        params["query_embed"],                          # rows 16..23
        params["wo"].reshape(NUM_LAYERS * HIDDEN, HIDDEN),  # rows 24..87
    ], axis=0)                                          # (P_ROWS, D)

    out_slab = fused_forward(px, pos_eff, param_slab)   # (B, Nq, 145)

    # masks of the NestedTensor are all-valid here and unused downstream.
    return {
        "pred": out_slab[..., PRED_COL],                    # (B, NUM_ROLL*NUM_QUERIES)
        "attn_weights": out_slab[..., ATTN_COL:PRED_COL],   # (B, Nq, S)
        "hs": out_slab[..., HS_COL:ATTN_COL],               # (B, Nq, D)  normalized last-layer
        "hs_ori": out_slab[..., HS_ORI_COL:HS_COL],         # (B, Nq, D)  pre-normalization
    }


if __name__ == "__main__":
    key = jax.random.PRNGKey(0)
    pkey, xkey = jax.random.split(key)
    params = init_params(pkey)
    samples = jax.random.normal(xkey, (B, IMG_C, IMG_H, IMG_W), jnp.float32)

    out = my_model_forward(samples, params)
    out = jax.tree_util.tree_map(jax.block_until_ready, out)

    assert out["pred"].shape == (B, NQ_TOTAL)
    assert out["attn_weights"].shape == (B, NQ_TOTAL, S_TOTAL)
    assert out["hs"].shape == (B, NQ_TOTAL, HIDDEN)
    assert out["hs_ori"].shape == (B, NQ_TOTAL, HIDDEN)
    assert bool(jnp.all(jnp.isfinite(out["pred"])))
    # softmax rows of the attention weights must sum to 1 (exact reciprocal used)
    assert bool(jnp.allclose(jnp.sum(out["attn_weights"], axis=-1), 1.0, atol=1e-5))

    print("KERNEL_OK")
</pallas_src>

<mosaic_0001>
module attributes {stable_mosaic.version = 11 : i64} {
  func.func @_fused_forward_kernel(%arg0: i32, %arg1: memref<1x80x6xf32, #tpu.memory_space<vmem>>, %arg2: memref<1x80x32xf32, #tpu.memory_space<vmem>>, %arg3: memref<88x32xf32, #tpu.memory_space<vmem>>, %arg4: memref<1x16x145xf32, #tpu.memory_space<vmem>>) attributes {dimension_semantics = [#tpu.dimension_semantics<parallel>], iteration_bounds = array<i64: 2>, scalar_prefetch = 0 : i64, scratch_operands = 0 : i64, tpu.core_type = #tpu.core_type<tc>, window_params = [{transform_indices = @transform_0, window_bounds = array<i64: 1, 80, 6>}, {transform_indices = @transform_1, window_bounds = array<i64: 1, 80, 32>}, {pipeline_mode = #tpu.pipeline_mode<synchronous>, transform_indices = @transform_2, window_bounds = array<i64: 88, 32>}, {transform_indices = @transform_3, window_bounds = array<i64: 1, 16, 145>}]} {
    %c0 = arith.constant 0 : index
    %c0_0 = arith.constant 0 : index
    %0 = vector.load %arg3[%c0, %c0_0] : memref<88x32xf32, #tpu.memory_space<vmem>>, vector<6x32xf32>
    %c0_1 = arith.constant 0 : index
    %c0_2 = arith.constant 0 : index
    %c0_3 = arith.constant 0 : index
    %1 = vector.load %arg1[%c0_1, %c0_2, %c0_3] : memref<1x80x6xf32, #tpu.memory_space<vmem>>, vector<1x80x6xf32>
    %2 = vector.shape_cast %1 : vector<1x80x6xf32> to vector<80x6xf32>
    %cst = arith.constant dense<0.000000e+00> : vector<80x32xf32>
    %3 = tpu.matmul %2, %0, %cst {dimension_numbers = #tpu.dot_dimension_numbers<[1], [0], [0], [1], [0, 0, 1, 1], [], []>} : vector<80x6xf32>, vector<6x32xf32>, vector<80x32xf32> -> vector<80x32xf32>
    %c0_4 = arith.constant 0 : index
    %c0_5 = arith.constant 0 : index
    %c0_6 = arith.constant 0 : index
    %4 = vector.load %arg2[%c0_4, %c0_5, %c0_6] : memref<1x80x32xf32, #tpu.memory_space<vmem>>, vector<1x80x32xf32>
    %5 = vector.shape_cast %4 : vector<1x80x32xf32> to vector<80x32xf32>
    %6 = arith.addf %3, %5 : vector<80x32xf32>
    %c16 = arith.constant 16 : index
    %c0_7 = arith.constant 0 : index
    %7 = vector.load %arg3[%c16, %c0_7] : memref<88x32xf32, #tpu.memory_space<vmem>>, vector<8x32xf32>
    %8 = vector.extract_strided_slice %7 {offsets = [0, 16], sizes = [8, 16], strides = [1, 1]} : vector<8x32xf32> to vector<8x16xf32>
    %9 = vector.extract_strided_slice %7 {offsets = [0, 0], sizes = [8, 16], strides = [1, 1]} : vector<8x32xf32> to vector<8x16xf32>
    %10 = tpu.concatenate %8, %9 in 1 : vector<8x16xf32>, vector<8x16xf32> -> vector<8x32xf32>
    %11 = tpu.concatenate %7, %10 in 0 : vector<8x32xf32>, vector<8x32xf32> -> vector<16x32xf32>
    %cst_8 = arith.constant 0.000000e+00 : f32
    %12 = vector.broadcast %cst_8 : f32 to vector<16x32xf32>
    %13 = arith.addf %12, %11 : vector<16x32xf32>
    %cst_9 = arith.constant 0.176776692 : f32
    %14 = vector.broadcast %cst_9 : f32 to vector<16x32xf32>
    %15 = arith.mulf %13, %14 : vector<16x32xf32>
    %cst_10 = arith.constant dense<0.000000e+00> : vector<16x80xf32>
    %16 = tpu.matmul %15, %6, %cst_10 {dimension_numbers = #tpu.dot_dimension_numbers<[1], [1], [0], [0], [0, 0, 1, 0], [], []>} : vector<16x32xf32>, vector<80x32xf32>, vector<16x80xf32> -> vector<16x80xf32>
    %cst_11 = arith.constant dense<0xFF800000> : vector<16xf32>
    %17 = vector.multi_reduction <maximumf>, %16, %cst_11 [1] : vector<16x80xf32> to vector<16xf32>
    %18 = vector.shape_cast %17 : vector<16xf32> to vector<16x1xf32>
    %19 = vector.broadcast %18 : vector<16x1xf32> to vector<16x80xf32>
    %20 = arith.subf %16, %19 : vector<16x80xf32>
    %21 = math.exp %20 : vector<16x80xf32>
    %cst_12 = arith.constant dense<0.000000e+00> : vector<16xf32>
    %22 = vector.multi_reduction <add>, %21, %cst_12 [1] : vector<16x80xf32> to vector<16xf32>
    %23 = vector.shape_cast %22 : vector<16xf32> to vector<16x1xf32>
    %24 = tpu.reciprocal %23 : vector<16x1xf32> -> vector<16x1xf32>
    %25 = vector.broadcast %24 : vector<16x1xf32> to vector<16x80xf32>
    %26 = arith.mulf %21, %25 : vector<16x80xf32>
    %cst_13 = arith.constant dense<0.000000e+00> : vector<16x32xf32>
    %27 = tpu.matmul %26, %6, %cst_13 {dimension_numbers = #tpu.dot_dimension_numbers<[1], [0], [0], [1], [0, 0, 1, 1], [], []>} : vector<16x80xf32>, vector<80x32xf32>, vector<16x32xf32> -> vector<16x32xf32>
    %c24 = arith.constant 24 : index
    %c0_14 = arith.constant 0 : index
    %28 = vector.load %arg3[%c24, %c0_14] : memref<88x32xf32, #tpu.memory_space<vmem>>, vector<32x32xf32>
    %cst_15 = arith.constant dense<0.000000e+00> : vector<16x32xf32>
    %29 = tpu.matmul %27, %28, %cst_15 {dimension_numbers = #tpu.dot_dimension_numbers<[1], [0], [0], [1], [0, 0, 1, 1], [], []>} : vector<16x32xf32>, vector<32x32xf32>, vector<16x32xf32> -> vector<16x32xf32>
    %30 = arith.addf %12, %29 : vector<16x32xf32>
    %31 = arith.addf %30, %11 : vector<16x32xf32>
    %cst_16 = arith.constant 0.176776692 : f32
    %32 = vector.broadcast %cst_16 : f32 to vector<16x32xf32>
    %33 = arith.mulf %31, %32 : vector<16x32xf32>
    %cst_17 = arith.constant dense<0.000000e+00> : vector<16x80xf32>
    %34 = tpu.matmul %33, %6, %cst_17 {dimension_numbers = #tpu.dot_dimension_numbers<[1], [1], [0], [0], [0, 0, 1, 0], [], []>} : vector<16x32xf32>, vector<80x32xf32>, vector<16x80xf32> -> vector<16x80xf32>
    %cst_18 = arith.constant dense<0xFF800000> : vector<16xf32>
    %35 = vector.multi_reduction <maximumf>, %34, %cst_18 [1] : vector<16x80xf32> to vector<16xf32>
    %36 = vector.shape_cast %35 : vector<16xf32> to vector<16x1xf32>
    %37 = vector.broadcast %36 : vector<16x1xf32> to vector<16x80xf32>
    %38 = arith.subf %34, %37 : vector<16x80xf32>
    %39 = math.exp %38 : vector<16x80xf32>
    %cst_19 = arith.constant dense<0.000000e+00> : vector<16xf32>
    %40 = vector.multi_reduction <add>, %39, %cst_19 [1] : vector<16x80xf32> to vector<16xf32>
    %41 = vector.shape_cast %40 : vector<16xf32> to vector<16x1xf32>
    %42 = tpu.reciprocal %41 : vector<16x1xf32> -> vector<16x1xf32>
    %43 = vector.broadcast %42 : vector<16x1xf32> to vector<16x80xf32>
    %44 = arith.mulf %39, %43 : vector<16x80xf32>
    %cst_20 = arith.constant dense<0.000000e+00> : vector<16x32xf32>
    %45 = tpu.matmul %44, %6, %cst_20 {dimension_numbers = #tpu.dot_dimension_numbers<[1], [0], [0], [1], [0, 0, 1, 1], [], []>} : vector<16x80xf32>, vector<80x32xf32>, vector<16x32xf32> -> vector<16x32xf32>
    %c56 = arith.constant 56 : index
    %c0_21 = arith.constant 0 : index
    %46 = vector.load %arg3[%c56, %c0_21] : memref<88x32xf32, #tpu.memory_space<vmem>>, vector<32x32xf32>
    %cst_22 = arith.constant dense<0.000000e+00> : vector<16x32xf32>
    %47 = tpu.matmul %45, %46, %cst_22 {dimension_numbers = #tpu.dot_dimension_numbers<[1], [0], [0], [1], [0, 0, 1, 1], [], []>} : vector<16x32xf32>, vector<32x32xf32>, vector<16x32xf32> -> vector<16x32xf32>
    %48 = arith.addf %30, %47 : vector<16x32xf32>
    %49 = arith.mulf %48, %48 : vector<16x32xf32>
    %cst_23 = arith.constant dense<0.000000e+00> : vector<16xf32>
    %50 = vector.multi_reduction <add>, %49, %cst_23 [1] : vector<16x32xf32> to vector<16xf32>
    %51 = vector.shape_cast %50 : vector<16xf32> to vector<16x1xf32>
    %cst_24 = arith.constant 1.000000e-24 : f32
    %52 = vector.broadcast %cst_24 : f32 to vector<16x1xf32>
    %53 = arith.addf %51, %52 : vector<16x1xf32>
    %54 = math.rsqrt %53 : vector<16x1xf32>
    %55 = vector.broadcast %54 : vector<16x1xf32> to vector<16x32xf32>
    %56 = arith.mulf %48, %55 : vector<16x32xf32>
    %c8 = arith.constant 8 : index
    %c0_25 = arith.constant 0 : index
    %57 = vector.load %arg3[%c8, %c0_25] : memref<88x32xf32, #tpu.memory_space<vmem>>, vector<1x32xf32>
    %58 = vector.broadcast %57 : vector<1x32xf32> to vector<16x32xf32>
    %59 = arith.mulf %56, %58 : vector<16x32xf32>
    %cst_26 = arith.constant dense<0.000000e+00> : vector<16xf32>
    %60 = vector.multi_reduction <add>, %59, %cst_26 [1] : vector<16x32xf32> to vector<16xf32>
    %61 = vector.shape_cast %60 : vector<16xf32> to vector<16x1xf32>
    %62 = math.tanh %61 : vector<16x1xf32>
    %63 = tpu.concatenate %48, %56, %44, %62 in 1 : vector<16x32xf32>, vector<16x32xf32>, vector<16x80xf32>, vector<16x1xf32> -> vector<16x145xf32>
    %c0_27 = arith.constant 0 : index
    %c0_28 = arith.constant 0 : index
    %c0_29 = arith.constant 0 : index
    %64 = vector.load %arg4[%c0_27, %c0_28, %c0_29] : memref<1x16x145xf32, #tpu.memory_space<vmem>>, vector<1x16x145xf32>
    %65 = vector.shape_cast %64 : vector<1x16x145xf32> to vector<16x145xf32>
    %66 = vector.shape_cast %63 : vector<16x145xf32> to vector<1x16x145xf32>
    tpu.vector_store %arg4[%c0_27, %c0_28, %c0_29], %66 {strides = array<i32>} : memref<1x16x145xf32, #tpu.memory_space<vmem>>, vector<1x16x145xf32>,
    return
  }
  func.func @transform_0(%arg0: i32) -> (i32, i32, i32) {
    %c0_i32 = arith.constant 0 : i32
    %c0_i32_0 = arith.constant 0 : i32
    %c0_i32_1 = arith.constant 0 : i32
    return %arg0, %c0_i32, %c0_i32_0 : i32, i32, i32
  }
  func.func @transform_1(%arg0: i32) -> (i32, i32, i32) {
    %c0_i32 = arith.constant 0 : i32
    %c0_i32_0 = arith.constant 0 : i32
    %c0_i32_1 = arith.constant 0 : i32
    return %arg0, %c0_i32, %c0_i32_0 : i32, i32, i32
  }
  func.func @transform_2(%arg0: i32) -> (i32, i32) {
    %c0_i32 = arith.constant 0 : i32
    %c0_i32_0 = arith.constant 0 : i32
    %c0_i32_1 = arith.constant 0 : i32
    return %c0_i32, %c0_i32_0 : i32, i32
  }
  func.func @transform_3(%arg0: i32) -> (i32, i32, i32) {
    %c0_i32 = arith.constant 0 : i32
    %c0_i32_0 = arith.constant 0 : i32
    %c0_i32_1 = arith.constant 0 : i32
    return %arg0, %c0_i32, %c0_i32_0 : i32, i32, i32
  }
}

</mosaic_0001>

<bundles_post_ra>
// kernel: my_model_forward.1
= control target key start
LH: loop header
LB: loop body
LE: loop exit
PB: predicated region body
PF: predicated region fallthrough
CT: control target
= control target key end

     0   :  { %s886_s12 = smov 0   ;;  %s1054_s0 = inlined_call_operand.vmem [shape: f32[2,80,6], index: 0, kind: input, shape index: {}]   ;;  %s1055_s1 = inlined_call_operand.vmem [shape: f32[2,80,32], index: 1, kind: input, shape index: {}]   ;;  %s1056_s2 = inlined_call_operand.vmem [shape: f32[88,32], index: 2, kind: input, shape index: {}]   ;;  %s1057_s3 = inlined_call_operand.vmem [shape: f32[2,16,145], index: 3, kind: output, shape index: {}]  }
   0x1 LB: > { %s761_s13 = sadd.s32 4294967295, %s860_s12   ;;  %p765_p0 = scmp.ge.s32.totalorder %s860_s12, 1  ;;  %s860_s12 = sphi %s886_s12, %s13_s12  }
   0x2   : > { %p147_p1 = scmp.lt.s32.totalorder %s860_s12, 3 }
   0x4   : > { %p148_p2 = pnand %p765_p0, %p147_p1 }
   0x5   : > { %p176_p3 = scmp.lt.s32.totalorder (!%p148_p2), %s761_s13, 1  ;;  %s862_s22 = smov (!%p148_p2), 112  }
   0x6   : > { %151 = sbr.rel (%p148_p2) target bundleno = 1878 (0x756), region = 32  ;;  %s863_s23 = smov (!%p148_p2), 16  }
   0x7   : > { %s864_s8 = smov (!%p148_p2), 64  }
   0xb   : > { %v191_v0 = vld [vmem:[%s1056_s2] sm:$0x3f]  ;;  %vm243_vm0 = vcmask 1045504   ;;  %s1059_s13 = smov (!%p176_p3, %s761_s13), 1  ;;  %vm212_vm1 = vcmask 48128   ;;  %v912_v7 = vld [vmem:[%s1056_s2 + $0x10] sm:$0xff] }
   0xc   : > { %770 = vmatpush.msk.msra.mxu0 %vm243_vm0, %v191_v0  ;;  %s816_s16 = smul.u32 80, %s1059_s13  ;;  %296 = vrot.lane.b32.xlu0 %v912_v7, %s862_s22  ;;  %v449_v23 = vld [vmem:[%s1056_s2 + $0x30] sm:$0xff]  ;;  %v448_v24 = vld [vmem:[%s1056_s2 + $0x28] sm:$0xff]  ;;  %v447_v25 = vld [vmem:[%s1056_s2 + $0x20] sm:$0xff]  ;;  %vm308_vm2 = vcmask 261120   ;;  %vm302_vm3 = vcmask 130048  }
   0xd   : > { %468 = vmatpush.msra.mxu3 %v449_v23  ;;  %v446_v27 = vld [vmem:[%s1056_s2 + $0x18] sm:$0xff]  ;;  %v306_v47 = vmul.f32 0.17677669, %v912_v7  ;;  %vm368_vm4 = vcmask 654336   ;;  %s815_s22 = sshll.u32 %s1059_s13, 5 }
   0xe   : > { %s180_s19 = scalar_lea.vmem %s1054_s0, %s816_s16  ;;  %s923_s26 = scalar_lea.vmem %s1055_s1, %s816_s16 }
   0xf   : > { %v192_v1 = vld [vmem:[%s180_s19] sm:$0xff]  ;;  %v193_v2 = vld [vmem:[%s180_s19 + $0x8] sm:$0xff]  ;;  %v194_v3 = vld [vmem:[%s180_s19 + $0x10] sm:$0xff]  ;;  %469 = vmatpush.msra.mxu3 %v448_v24  ;;  %s190_s25 = scalar_lea.vmem %s1057_s3, %s815_s22 }
  0x10   : > { %771 = vmatmul.msk.f32.vlgmr.msra.gmra.mxu0 %vm212_vm1, %v192_v1  ;;  %v195_v4 = vld [vmem:[%s180_s19 + $0x18] sm:$0xff]  ;;  %v196_v5 = vld [vmem:[%s180_s19 + $0x20] sm:$0xff]  ;;  %v197_v6 = vld [vmem:[%s180_s19 + $0x28] sm:$0xff] }
  0x11   : > { %v198_v8 = vld [vmem:[%s180_s19 + $0x30] sm:$0xff]  ;;  %v199_v9 = vld [vmem:[%s180_s19 + $0x38] sm:$0xff]  ;;  %v200_v10 = vld [vmem:[%s180_s19 + $0x40] sm:$0xff]  ;;  %470 = vmatpush.msra.mxu3 %v447_v25 }
  0x12   : > { %v201_v11 = vld [vmem:[%s180_s19 + $0x48] sm:$0xff]  ;;  %v202_v12 = vld [vmem:[%s923_s26] sm:$0xff]  ;;  %v204_v18 = vld [vmem:[%s923_s26 + $0x10] sm:$0xff]  ;;  %s865_s19 = smov 32  }
  0x13   : > { %v203_v15 = vld [vmem:[%s923_s26 + $0x8] sm:$0xff]  ;;  %471 = vmatpush.msra.mxu3 %v446_v27  ;;  %v210_v32 = vld [vmem:[%s923_s26 + $0x40] sm:$0xff]  ;;  %v209_v35 = vld [vmem:[%s923_s26 + $0x38] sm:$0xff] }
  0x14   : > { %299 = vrot.lane.b32.xlu0 %v912_v7, %s863_s23  ;;  %v211_v31 = vld [vmem:[%s923_s26 + $0x48] sm:$0xff]  ;;  %v208_v37 = vld [vmem:[%s923_s26 + $0x30] sm:$0xff]  ;;  %v206_v41 = vld [vmem:[%s923_s26 + $0x20] sm:$0xff] }
  0x15   : > { %v207_v39 = vld [vmem:[%s923_s26 + $0x28] sm:$0xff]  ;;  %v205_v43 = vld [vmem:[%s923_s26 + $0x18] sm:$0xff] }
  0x18   : > { %772 = vmatmul.msk.f32.gmra.mxu0 %vm212_vm1, %v193_v2 }
  0x20   : > { %773 = vmatmul.msk.f32.gmra.mxu0 %vm212_vm1, %v194_v3 }
  0x28   : > { %774 = vmatmul.msk.f32.gmra.mxu0 %vm212_vm1, %v195_v4 }
  0x30   : > { %775 = vmatmul.msk.f32.gmra.mxu0 %vm212_vm1, %v196_v5 }
  0x38   : > { %776 = vmatmul.msk.f32.gmra.mxu0 %vm212_vm1, %v197_v6 }
  0x40   : > { %777 = vmatmul.msk.f32.gmra.mxu0 %vm212_vm1, %v198_v8 }
  0x48   : > { %778 = vmatmul.msk.f32.gmra.mxu0 %vm212_vm1, %v199_v9 }
  0x50   : > { %779 = vmatmul.msk.f32.gmra.mxu0 %vm212_vm1, %v200_v10 }
  0x58   : > { %780 = vmatmul.msk.f32.gmra.mxu0 %vm212_vm1, %v201_v11 }
  0x7e   : > { %v297_v46 = vpop.permute.xlu0 %296 }
  0x86   : > { %v300_v48 = vpop.permute.xlu0 %299 }
  0x87   : > { %v988_v49 = vsel %vm302_vm3, %v297_v46, %v300_v48 }
  0x88   : > { %v307_v50 = vmul.f32 0.17677669, %v988_v49 }
  0x8d   : > { %v264_v13 = vpop.f32.mrf.mxu0 }
  0x8e   : > { %v926_v14 = vadd.f32 %v264_v13, %v202_v12 }
  0x95   : > { %v267_v16 = vpop.f32.mrf.mxu0 }
  0x96   : > { %v929_v17 = vadd.f32 %v267_v16, %v203_v15 }
  0x9d   : > { %v270_v19 = vpop.f32.mrf.mxu0 }
  0x9e   : > { %v932_v20 = vadd.f32 %v270_v19, %v204_v18 }
  0xa5   : > { %v273_v21 = vpop.f32.mrf.mxu0 }
  0xa6   : > { %v274_v45 = vadd.f32 %v273_v21, %v205_v43 }
  0xad   : > { %v276_v22 = vpop.f32.mrf.mxu0 }
  0xae   : > { %v277_v44 = vadd.f32 %v276_v22, %v206_v41 }
  0xb5   : > { %v279_v26 = vpop.f32.mrf.mxu0 }
  0xb6   : > { %v280_v42 = vadd.f32 %v279_v26, %v207_v39 }
  0xbd   : > { %v282_v28 = vpop.f32.mrf.mxu0 }
  0xbe   : > { %v283_v40 = vadd.f32 %v282_v28, %v208_v37 }
  0xc5   : > { %v285_v29 = vpop.f32.mrf.mxu0 }
  0xc6   : > { %v286_v38 = vadd.f32 %v285_v29, %v209_v35 }
  0xcd   : > { %v288_v30 = vpop.f32.mrf.mxu0 }
  0xce   : > { %v289_v36 = vadd.f32 %v288_v30, %v210_v32 }
  0xd5   : > { %v291_v33 = vpop.f32.mrf.mxu0 }
  0xd6   : > { %v292_v34 = vadd.f32 %v291_v33, %v211_v31 }
  0xd8   : > { %781 = vmatpush.xpose.msk.msra.mxu1 %vm308_vm2, %v292_v34  ;;  %429 = vmatpush.msra.mxu2 %v292_v34 }
  0xd9   : > { %797 = vmatpush.xpose.msk.msrb.mxu3 %vm308_vm2, %v292_v34 }
  0xda   : > { %430 = vmatpush.msra.mxu2 %v289_v36 }
  0xdc   : > { %782 = vmatpush.xpose.msk.msra.mxu1 %vm308_vm2, %v289_v36  ;;  %431 = vmatpush.msra.mxu2 %v286_v38 }
  0xdd   : > { %798 = vmatpush.xpose.msk.msrb.mxu3 %vm308_vm2, %v289_v36 }
  0xde   : > { %432 = vmatpush.msra.mxu2 %v283_v40 }
  0xe0   : > { %783 = vmatpush.xpose.msk.msra.mxu1 %vm308_vm2, %v286_v38  ;;  %433 = vmatpush.msra.mxu2 %v280_v42 }
  0xe1   : > { %799 = vmatpush.xpose.msk.msrb.mxu3 %vm308_vm2, %v286_v38 }
  0xe2   : > { %434 = vmatpush.msra.mxu2 %v277_v44 }
  0xe4   : > { %784 = vmatpush.xpose.msk.msra.mxu1 %vm308_vm2, %v283_v40  ;;  %435 = vmatpush.msra.mxu2 %v274_v45 }
  0xe5   : > { %800 = vmatpush.xpose.msk.msrb.mxu3 %vm308_vm2, %v283_v40 }
  0xe6   : > { %436 = vmatpush.msra.mxu2 %v932_v20 }
  0xe8   : > { %785 = vmatpush.xpose.msk.msra.mxu1 %vm308_vm2, %v280_v42  ;;  %437 = vmatpush.msra.mxu2 %v929_v17 }
  0xe9   : > { %801 = vmatpush.xpose.msk.msrb.mxu3 %vm308_vm2, %v280_v42 }
  0xea   : > { %438 = vmatpush.msra.mxu2 %v926_v14 }
  0xec   : > { %572 = vmatpush.msrb.mxu2 %v292_v34  ;;  %786 = vmatpush.xpose.msk.msra.mxu1 %vm308_vm2, %v277_v44 }
  0xed   : > { %802 = vmatpush.xpose.msk.msrb.mxu3 %vm308_vm2, %v277_v44 }
  0xee   : > { %573 = vmatpush.msrb.mxu2 %v289_v36 }
  0xf0   : > { %574 = vmatpush.msrb.mxu2 %v286_v38  ;;  %787 = vmatpush.xpose.msk.msra.mxu1 %vm308_vm2, %v274_v45 }
  0xf1   : > { %803 = vmatpush.xpose.msk.msrb.mxu3 %vm308_vm2, %v274_v45 }
  0xf2   : > { %575 = vmatpush.msrb.mxu2 %v283_v40 }
  0xf4   : > { %576 = vmatpush.msrb.mxu2 %v280_v42  ;;  %788 = vmatpush.xpose.msk.msra.mxu1 %vm308_vm2, %v932_v20 }
  0xf5   : > { %804 = vmatpush.xpose.msk.msrb.mxu3 %vm308_vm2, %v932_v20 }
  0xf6   : > { %577 = vmatpush.msrb.mxu2 %v277_v44 }
  0xf8   : > { %578 = vmatpush.msrb.mxu2 %v274_v45  ;;  %789 = vmatpush.xpose.msk.msra.mxu1 %vm308_vm2, %v929_v17 }
  0xf9   : > { %805 = vmatpush.xpose.msk.msrb.mxu3 %vm308_vm2, %v929_v17 }
  0xfa   : > { %579 = vmatpush.msrb.mxu2 %v932_v20 }
  0xfc   : > { %580 = vmatpush.msrb.mxu2 %v929_v17  ;;  %790 = vmatpush.xpose.msk.msra.mxu1 %vm308_vm2, %v926_v14 }
  0xfd   : > { %806 = vmatpush.xpose.msk.msrb.mxu3 %vm308_vm2, %v926_v14 }
  0xfe   : > { %581 = vmatpush.msrb.mxu2 %v926_v14 }
  0xff   : > { %791 = vmatmul.msk.f32.vlgmr.msra.gmra.mxu1 %vm308_vm2, %v306_v47 }
 0x107   : > { %792 = vmatmul.msk.f32.gmra.mxu1 %vm308_vm2, %v307_v50 }
 0x17c   : > { %v362_v51 = vpop.f32.mrf.mxu1 }
 0x17d   : > { %v369_v52 = vsel %vm368_vm4, %v362_v51, -inf }
 0x17e   : > { %370 = vmax.xlane.f32.xlu1 %v369_v52 }
 0x184   : > { %v365_v53 = vpop.f32.mrf.mxu1 }
 0x185   : > { %v372_v54 = vsel %vm368_vm4, %v365_v53, -inf }
 0x186   : > { %373 = vmax.xlane.f32.xlu1 %v372_v54 }
 0x1f1   : > { %v371_v55 = vpop.xlane.xlu1 %370 }
 0x1f2   : > { %v375_v56 = vsub.f32 %v362_v51, %v371_v55 }
 0x1f4   : > { %v377_v57 = vmul.f32 1.442695, %v375_v56 }
 0x1f6   : > { %830 = vpow2.f32 %v377_v57 }
 0x1f9   : > { %v374_v58 = vpop.xlane.xlu1 %373 }
 0x1fa   : > { %v376_v59 = vsub.f32 %v365_v53, %v374_v58 }
 0x1fc   : > { %v831_v60 = vpop.eup %830  ;;  %v379_v61 = vmul.f32 1.442695, %v376_v59 }
 0x1fd   : > { %v381_v62 = vsel %vm368_vm4, %v831_v60, 0.0 }
 0x1fe   : > { %832 = vpow2.f32 %v379_v61  ;;  %382 = vadd.xlane.f32.xlu2 %v381_v62 }
 0x204   : > { %v833_v63 = vpop.eup %832 }
 0x205   : > { %v384_v0 = vsel %vm368_vm4, %v833_v63, 0.0 }
 0x206   : > { %385 = vadd.xlane.f32.xlu2 %v384_v0 }
 0x271   : > { %v383_v1 = vpop.xlane.xlu2 %382 }
 0x272   : > { %834 = vrcp.f32 %v383_v1  ;;  %v398_v6 = vand.u32 2147483648, %v383_v1  ;;  %v396_v9 = vand.u32 2147483647, %v383_v1  ;;  %vm392_vm6 = vweird.f32 %v383_v1 }
 0x274   : > { %v399_v12 = vor.u32 1.1754944e-38, %v398_v6  ;;  %vm397_vm8 = vcmp.eq.f32.partialorder %v396_v9, 8.507059e+37  ;;  %v591_v9 = vld [vmem:[%s1056_s2 + $0x48] sm:$0xff] }
 0x278   : > { %v835_v2 = vpop.eup %834 }
 0x279   : > { %v388_v3 = vmul.f32 %v835_v2, %v383_v1  ;;  %v386_v4 = vpop.xlane.xlu2 %385  ;;  %vm393_vm5 = vweird.f32 %v835_v2 }
 0x27a   : > { %836 = vrcp.f32 %v386_v4  ;;  %vm394_vm7 = vmor %vm392_vm6, %vm393_vm5  ;;  %v412_v18 = vand.u32 2147483648, %v386_v4  ;;  %v410_v20 = vand.u32 2147483647, %v386_v4  ;;  %vm406_vm10 = vweird.f32 %v386_v4 }
 0x27b   : > { %v389_v5 = vsub.f32 1.0, %v388_v3 }
 0x27c   : > { %v413_v22 = vor.u32 1.1754944e-38, %v412_v18  ;;  %vm411_vm12 = vcmp.eq.f32.partialorder %v410_v20, 8.507059e+37 }
 0x27d   : > { %v390_v8 = vmul.f32 %v835_v2, %v389_v5 }
 0x27f   : > { %v391_v10 = vadd.f32 %v835_v2, %v390_v8  ;;  %v592_v8 = vld [vmem:[%s1056_s2 + $0x50] sm:$0xff] }
 0x280   : > { %v837_v11 = vpop.eup %836  ;;  %611 = vmatpush.msrb.mxu1 %v592_v8 }
 0x281   : > { %v402_v13 = vmul.f32 %v837_v11, %v386_v4  ;;  %v395_v14 = vsel %vm394_vm7, %v835_v2, %v391_v10  ;;  %vm407_vm9 = vweird.f32 %v837_v11  ;;  %v590_v10 = vld [vmem:[%s1056_s2 + $0x40] sm:$0xff] }
 0x282   : > { %v400_v15 = vsel %vm397_vm8, %v399_v12, %v395_v14  ;;  %vm408_vm11 = vmor %vm406_vm10, %vm407_vm9  ;;  %612 = vmatpush.msrb.mxu1 %v591_v9 }
 0x283   : > { %v403_v16 = vsub.f32 1.0, %v402_v13  ;;  %v415_v17 = vmul.f32 %v831_v60, %v400_v15 }
 0x284   : > { %613 = vmatpush.msrb.mxu1 %v590_v10 }
 0x285   : > { %v404_v19 = vmul.f32 %v837_v11, %v403_v16  ;;  %793 = vmatmul.msk.f32.vlgmr.msra.gmra.mxu2 %vm368_vm4, %v415_v17 }
 0x287   : > { %v405_v21 = vadd.f32 %v837_v11, %v404_v19 }
 0x289   : > { %v409_v23 = vsel %vm408_vm11, %v837_v11, %v405_v21  ;;  %v589_v11 = vld [vmem:[%s1056_s2 + $0x38] sm:$0xff] }
 0x28a   : > { %v414_v24 = vsel %vm411_vm12, %v413_v22, %v409_v23  ;;  %614 = vmatpush.msrb.mxu1 %v589_v11 }
 0x28b   : > { %v416_v25 = vmul.f32 %v833_v63, %v414_v24 }
 0x28d   : > { %794 = vmatmul.msk.f32.gmra.mxu2 %vm368_vm4, %v416_v25 }
 0x308   : > { %v440_v26 = vpop.f32.mrf.mxu2 }
 0x309   : > { %795 = vmatmul.msk.f32.vlgmr.msra.gmra.mxu3 %vm308_vm2, %v440_v26 }
 0x310   : > { %v443_v27 = vpop.f32.mrf.mxu2 }
 0x311   : > { %796 = vmatmul.msk.f32.gmra.mxu3 %vm308_vm2, %v443_v27 }
 0x38c   : > { %v1000_v28 = vpop.f32.mrf.mxu3 }
 0x38d   : > { %v479_v29 = vadd.f32 %v1000_v28, %v912_v7 }
 0x38f   : > { %v481_v30 = vmul.f32 0.17677669, %v479_v29 }
 0x391   : > { %807 = vmatmul.msk.f32.vlgmr.msrb.gmra.mxu3 %vm308_vm2, %v481_v30 }
 0x394   : > { %v1005_v31 = vpop.f32.mrf.mxu3 }
 0x395   : > { %v480_v32 = vadd.f32 %v1005_v31, %v988_v49 }
 0x397   : > { %v482_v33 = vmul.f32 0.17677669, %v480_v32 }
 0x399   : > { %808 = vmatmul.msk.f32.gmra.mxu3 %vm308_vm2, %v482_v33 }
 0x414   : > { %v506_v34 = vpop.f32.mrf.mxu3 }
 0x415   : > { %v512_v35 = vsel %vm368_vm4, %v506_v34, -inf }
 0x416   : > { %513 = vmax.xlane.f32.xlu0 %v512_v35 }
 0x41c   : > { %v509_v36 = vpop.f32.mrf.mxu3 }
 0x41d   : > { %v515_v37 = vsel %vm368_vm4, %v509_v36, -inf }
 0x41e   : > { %516 = vmax.xlane.f32.xlu1 %v515_v37 }
 0x489   : > { %v514_v7 = vpop.xlane.xlu0 %513 }
 0x48a   : > { %v518_v38 = vsub.f32 %v506_v34, %v514_v7 }
 0x48c   : > { %v520_v39 = vmul.f32 1.442695, %v518_v38 }
 0x48e   : > { %838 = vpow2.f32 %v520_v39 }
 0x491   : > { %v517_v40 = vpop.xlane.xlu1 %516 }
 0x492   : > { %v519_v41 = vsub.f32 %v509_v36, %v517_v40 }
 0x494   : > { %v839_v42 = vpop.eup %838  ;;  %v522_v43 = vmul.f32 1.442695, %v519_v41  ;;  %v829_v41 = vld [vmem:[%s1056_s2 + $0x8] ss:$0 sm:$0xff] }
 0x495   : > { %v524_v44 = vsel %vm368_vm4, %v839_v42, 0.0 }
 0x496   : > { %840 = vpow2.f32 %v522_v43  ;;  %525 = vadd.xlane.f32.xlu2 %v524_v44 }
 0x49c   : > { %v841_v45 = vpop.eup %840 }
 0x49d   : > { %v527_v46 = vsel %vm368_vm4, %v841_v45, 0.0 }
 0x49e   : > { %528 = vadd.xlane.f32.xlu1 %v527_v46 }
 0x509   : > { %v526_v47 = vpop.xlane.xlu2 %525 }
 0x50a   : > { %842 = vrcp.f32 %v526_v47  ;;  %v541_v52 = vand.u32 2147483648, %v526_v47  ;;  %v539_v54 = vand.u32 2147483647, %v526_v47  ;;  %vm535_vm14 = vweird.f32 %v526_v47 }
 0x50c   : > { %v542_v57 = vor.u32 1.1754944e-38, %v541_v52  ;;  %vm540_vm0 = vcmp.eq.f32.partialorder %v539_v54, 8.507059e+37 }
 0x510   : > { %v843_v48 = vpop.eup %842 }
 0x511   : > { %v531_v49 = vmul.f32 %v843_v48, %v526_v47  ;;  %v529_v50 = vpop.xlane.xlu1 %528  ;;  %vm536_vm13 = vweird.f32 %v843_v48 }
 0x512   : > { %844 = vrcp.f32 %v529_v50  ;;  %vm537_vm15 = vmor %vm535_vm14, %vm536_vm13  ;;  %v555_v63 = vand.u32 2147483648, %v529_v50  ;;  %v553_v1 = vand.u32 2147483647, %v529_v50  ;;  %vm549_vm5 = vweird.f32 %v529_v50 }
 0x513   : > { %v532_v51 = vsub.f32 1.0, %v531_v49  ;;  %vm684_vm13 = vcmask 523264   ;;  %vm690_vm14 = vcmask 138240  }
 0x514   : > { %v556_v3 = vor.u32 1.1754944e-38, %v555_v63  ;;  %vm554_vm7 = vcmp.eq.f32.partialorder %v553_v1, 8.507059e+37 }
 0x515   : > { %v533_v53 = vmul.f32 %v843_v48, %v532_v51 }
 0x517   : > { %v534_v55 = vadd.f32 %v843_v48, %v533_v53 }
 0x518   : > { %v845_v56 = vpop.eup %844 }
 0x519   : > { %v545_v58 = vmul.f32 %v845_v56, %v529_v50  ;;  %v538_v59 = vsel %vm537_vm15, %v843_v48, %v534_v55  ;;  %vm550_vm1 = vweird.f32 %v845_v56 }
 0x51a   : > { %v543_v60 = vsel %vm540_vm0, %v542_v57, %v538_v59  ;;  %vm551_vm6 = vmor %vm549_vm5, %vm550_vm1 }
 0x51b   : > { %v546_v61 = vsub.f32 1.0, %v545_v58  ;;  %v558_v62 = vmul.f32 %v839_v42, %v543_v60 }
 0x51d   : > { %v547_v0 = vmul.f32 %v845_v56, %v546_v61  ;;  %676 = vrot.lane.b32.xlu0 %v558_v62, %s864_s8  ;;  %809 = vmatmul.msk.f32.vlgmr.msrb.gmra.mxu2 %vm368_vm4, %v558_v62 }
 0x51f   : > { %v548_v2 = vadd.f32 %v845_v56, %v547_v0 }
 0x521   : > { %v552_v4 = vsel %vm551_vm6, %v845_v56, %v548_v2 }
 0x522   : > { %v557_v5 = vsel %vm554_vm7, %v556_v3, %v552_v4 }
 0x523   : > { %v559_v6 = vmul.f32 %v841_v45, %v557_v5 }
 0x525   : > { %810 = vmatmul.msk.f32.gmra.mxu2 %vm368_vm4, %v559_v6 }
 0x58f   : > { %v677_v47 = vpop.permute.xlu0 %676 }
 0x5a0   : > { %v583_v12 = vpop.f32.mrf.mxu2 }
 0x5a1   : > { %811 = vmatmul.msk.f32.vlgmr.msrb.gmra.mxu1 %vm308_vm2, %v583_v12 }
 0x5a8   : > { %v586_v13 = vpop.f32.mrf.mxu2 }
 0x5a9   : > { %812 = vmatmul.msk.f32.gmra.mxu1 %vm308_vm2, %v586_v13 }
 0x61e   : > { %v616_v14 = vpop.f32.mrf.mxu1 }
 0x61f   : > { %v622_v15 = vadd.f32 %v616_v14, %v1000_v28 }
 0x621   : > { %v624_v16 = vmul.f32 %v622_v15, %v622_v15 }
 0x623   : > { %v626_v17 = vsel %vm308_vm2, %v624_v16, 0.0 }
 0x624   : > { %627 = vadd.xlane.f32.xlu2 %v626_v17 }
 0x626   : > { %v619_v18 = vpop.f32.mrf.mxu1 }
 0x627   : > { %v623_v19 = vadd.f32 %v619_v18, %v1005_v31 }
 0x629   : > { %v625_v20 = vmul.f32 %v623_v19, %v623_v19 }
 0x62b   : > { %v629_v21 = vsel %vm308_vm2, %v625_v20, 0.0 }
 0x62c   : > { %630 = vadd.xlane.f32.xlu1 %v629_v21 }
 0x697   : > { %v628_v22 = vpop.xlane.xlu2 %627 }
 0x698   : > { %v632_v23 = vadd.f32 1e-24, %v628_v22 }
 0x69a   : > { %846 = vrsqrt.f32 %v632_v23  ;;  %vm640_vm8 = vweird.f32 %v632_v23 }
 0x69f   : > { %v631_v24 = vpop.xlane.xlu1 %630 }
 0x6a0   : > { %v847_v25 = vpop.eup %846  ;;  %v633_v26 = vadd.f32 1e-24, %v631_v24 }
 0x6a1   : > { %v635_v27 = vmul.f32 %v847_v25, %v632_v23  ;;  %vm641_vm4 = vweird.f32 %v847_v25 }
 0x6a2   : > { %848 = vrsqrt.f32 %v633_v26  ;;  %vm642_vm9 = vmor %vm640_vm8, %vm641_vm4  ;;  %vm650_vm11 = vweird.f32 %v633_v26 }
 0x6a3   : > { %v636_v28 = vmul.f32 %v847_v25, %v635_v27 }
 0x6a5   : > { %v637_v29 = vmul.f32 0.5, %v636_v28 }
 0x6a7   : > { %v638_v30 = vsub.f32 1.5, %v637_v29 }
 0x6a8   : > { %v849_v32 = vpop.eup %848 }
 0x6a9   : > { %v645_v33 = vmul.f32 %v849_v32, %v633_v26  ;;  %v639_v31 = vmul.f32 %v847_v25, %v638_v30  ;;  %vm651_vm10 = vweird.f32 %v849_v32 }
 0x6aa   : > { %vm652_vm12 = vmor %vm650_vm11, %vm651_vm10 }
 0x6ab   : > { %v646_v34 = vmul.f32 %v849_v32, %v645_v33  ;;  %v643_v35 = vsel %vm642_vm9, %v847_v25, %v639_v31 }
 0x6ac   : > { %v654_v36 = vmul.f32 %v643_v35, %v622_v15 }
 0x6ad   : > { %v647_v37 = vmul.f32 0.5, %v646_v34 }
 0x6ae   : > { %670 = vrot.lane.b32.xlu2 %v654_v36, %s865_s19  ;;  %v658_v44 = vmul.f32 %v829_v41, %v654_v36 }
 0x6af   : > { %v648_v7 = vsub.f32 1.5, %v647_v37 }
 0x6b0   : > { %v660_v45 = vsel %vm308_vm2, %v658_v44, 0.0 }
 0x6b1   : > { %v649_v38 = vmul.f32 %v849_v32, %v648_v7 }
 0x6b3   : > { %v653_v39 = vsel %vm652_vm12, %v849_v32, %v649_v38 }
 0x6b4   : > { %v655_v40 = vmul.f32 %v653_v39, %v623_v19 }
 0x6b6   : > { %v659_v42 = vmul.f32 %v829_v41, %v655_v40 }
 0x6b8   : > { %v663_v43 = vsel %vm308_vm2, %v659_v42, 0.0 }
 0x6b9   : > { %664 = vadd.xlane.f32.xlu1 %v663_v43 }
 0x6d2   : > { %672 = vrot.lane.b32.xlu1 %v655_v40, %s865_s19 }
 0x6d7   : > { %661 = vadd.xlane.f32.xlu2 %v660_v45 }
 0x6ef   : > { %678 = vrot.lane.b32.xlu2 %v559_v6, %s864_s8 }
 0x708   : > { %v671_v46 = vpop.permute.xlu2 %670 }
 0x709   : > { %v682_v48 = vsel %vm308_vm2, %v622_v15, %v671_v46 }
 0x70a   : > { %v685_v49 = vsel %vm684_vm13, %v682_v48, %v677_v47 }
 0x70b   : > { %689 = vst [vmem:[%s190_s25] sm:$0xff] %v685_v49 }
 0x72c   : > { %v665_v50 = vpop.xlane.xlu1 %664 }
 0x744   : > { %v673_v52 = vpop.permute.xlu1 %672 }
 0x745   : > { %v683_v55 = vsel %vm308_vm2, %v623_v19, %v673_v52 }
 0x74a   : > { %v662_v51 = vpop.xlane.xlu2 %661 }
 0x74b   : > { %850 = vtanh.f32 %v662_v51 }
 0x74c   : > { %852 = vtanh.f32 %v665_v50 }
 0x751   : > { %v851_v53 = vpop.eup %850 }
 0x752   : > { %v853_v54 = vpop.eup %852  ;;  %v687_v56 = vsel %vm302_vm3, %v677_v47, %v851_v53  ;;  %v679_v57 = vpop.permute.xlu2 %678 }
 0x753   : > { %691 = vst.msk [vmem:[%s190_s25 + $0x8] sm:$0xff] %vm690_vm14, %v687_v56  ;;  %v686_v58 = vsel %vm684_vm13, %v683_v55, %v679_v57  ;;  %v688_v59 = vsel %vm302_vm3, %v679_v57, %v853_v54 }
 0x754   : > { %692 = vst [vmem:[%s190_s25 + $0x10] sm:$0xff] %v686_v58 }
 0x755   : > { %693 = vst.msk [vmem:[%s190_s25 + $0x18] sm:$0xff] %vm690_vm14, %v688_v59 }
 0x756 PF: > { %s13_s12 = sadd.s32 1, %s860_s12  }
 0x757   : > { %p10_p4 = scmp.ge.s32.totalorder %s13_s12, 4  }
 0x759   :  { %12 = sbr.rel (!%p10_p4) target bundleno = 1 (0x1), region = 65 }

</bundles_post_ra>
